<compile_context>
chip_gen: v7x
topology: tpu7x:2x2x1
jax: 0.10.0
libtpu: 0.0.40
codegen_flags: <defaults>
</compile_context>

<pallas_src>
import functools

import jax
import jax.numpy as jnp
from jax.experimental import pallas as pl
from jax.experimental.pallas import tpu as pltpu

VOCAB = 64        # len(lang_token_dict)
D_MODEL = 32
MAX_SEQ = 16      # max_sequence_length (== input seq len, as the module requires)
BATCH = 2
DROP_P = 0.1


def _positional_encoding(seq_len, d_model):
    """Matches PositionalEncoding.forward(): interleaved sin/cos, shape (S, D)."""
    even_i = jnp.arange(0, d_model, 2, dtype=jnp.float32)            # (D/2,)
    denom = jnp.power(10000.0, even_i / float(d_model))              # (D/2,)
    pos = jnp.arange(seq_len, dtype=jnp.float32)[:, None]            # (S, 1)
    even_pe = jnp.sin(pos / denom)                                   # (S, D/2)
    odd_pe = jnp.cos(pos / denom)                                    # (S, D/2)
    return jnp.stack([even_pe, odd_pe], axis=2).reshape(seq_len, d_model)


def _sentence_embedding_kernel(ids_ref, table_ref, pe_ref, bits_ref, out_ref, *,
                               drop_threshold, keep_scale):
    n_tokens, _ = out_ref.shape
    vocab = table_ref.shape[0]

    # ---- embedding lookup: direct row gather (ids are SMEM scalars) ----
    for i in range(n_tokens):                        # static trip count, fully unrolled
        # Guard against out-of-range ids (PyTorch nn.Embedding would raise);
        # clamping avoids an unchecked OOB VMEM read.
        idx = jnp.clip(ids_ref[i], 0, vocab - 1)
        out_ref[pl.ds(i, 1), :] = table_ref[pl.ds(idx, 1), :]

    # ---- add (precomputed) positional encoding, then dropout ----
    x = out_ref[...] + pe_ref[...]
    keep = bits_ref[...] >= jnp.uint32(drop_threshold)   # integer-threshold dropout
    out_ref[...] = jnp.where(keep, x * keep_scale, 0.0).astype(out_ref.dtype)


def sentence_embedding(token_ids, emb_table, dropout_key, *, drop_p=DROP_P,
                       training=True):
    """token_ids: (B, S) int32, emb_table: (V, D) f32 -> (B, S, D) f32."""
    B, S = token_ids.shape
    V, D = emb_table.shape
    ids_flat = token_ids.reshape(B * S).astype(jnp.int32)

    # Constant PE table, tiled across batch (matches row-major flatten of (B, S)).
    pe_flat = jnp.tile(_positional_encoding(S, D), (B, 1)).astype(jnp.float32)

    # TODO(synk): PyTorch's dropout RNG stream cannot be bit-matched; uniform
    # uint32 bits come from jax.random (works on TPU and interpret mode alike)
    # and the mask/scale math stays in the kernel.
    bits = jax.random.bits(dropout_key, (B * S, D), dtype=jnp.uint32)

    if training and drop_p > 0.0:
        drop_threshold = min(int(drop_p * (1 << 32)), (1 << 32) - 1)
        keep_scale = 1.0 / (1.0 - drop_p)
    else:
        drop_threshold = 0           # keep everything, no scaling (eval mode)
        keep_scale = 1.0

    kernel = functools.partial(_sentence_embedding_kernel,
                               drop_threshold=drop_threshold,
                               keep_scale=keep_scale)
    out = pl.pallas_call(
        kernel,
        out_shape=jax.ShapeDtypeStruct((B * S, D), jnp.float32),
        in_specs=[
            pl.BlockSpec(memory_space=pltpu.MemorySpace.SMEM),   # token ids (scalars)
            pl.BlockSpec(memory_space=pltpu.MemorySpace.VMEM),   # embedding table
            pl.BlockSpec(memory_space=pltpu.MemorySpace.VMEM),   # positional encoding
            pl.BlockSpec(memory_space=pltpu.MemorySpace.VMEM),   # dropout bits
        ],
        out_specs=pl.BlockSpec(memory_space=pltpu.MemorySpace.VMEM),
    )(ids_flat, emb_table, pe_flat, bits)
    return out.reshape(B, S, D)


if __name__ == "__main__":
    key = jax.random.PRNGKey(0)
    k_emb, k_ids, k_drop = jax.random.split(key, 3)

    # nn.Embedding default init: N(0, 1)
    emb_table = jax.random.normal(k_emb, (VOCAB, D_MODEL), dtype=jnp.float32)
    token_ids = jax.random.randint(k_ids, (BATCH, MAX_SEQ), 0, VOCAB, dtype=jnp.int32)

    out = sentence_embedding(token_ids, emb_table, k_drop)
    jax.block_until_ready(out)
    assert out.shape == (BATCH, MAX_SEQ, D_MODEL)

    # Pure-JAX reference with the same dropout bits (training-mode semantics).
    pe = _positional_encoding(MAX_SEQ, D_MODEL)
    bits_ref = jax.random.bits(k_drop, (BATCH * MAX_SEQ, D_MODEL),
                               dtype=jnp.uint32).reshape(BATCH, MAX_SEQ, D_MODEL)
    thresh = jnp.uint32(min(int(DROP_P * (1 << 32)), (1 << 32) - 1))
    ref = emb_table[token_ids] + pe[None]
    ref = jnp.where(bits_ref >= thresh, ref * (1.0 / (1.0 - DROP_P)), 0.0)
    assert jnp.allclose(out, ref, rtol=1e-6, atol=1e-5)

    print("KERNEL_OK")
</pallas_src>

<mosaic_0001>
module attributes {stable_mosaic.version = 11 : i64} {
  func.func @_sentence_embedding_kernel(%arg0: memref<32xi32, #tpu.memory_space<smem>>, %arg1: memref<64x32xf32, #tpu.memory_space<vmem>>, %arg2: memref<32x32xf32, #tpu.memory_space<vmem>>, %arg3: memref<32x32xi32, #tpu.memory_space<vmem>>, %arg4: memref<32x32xf32, #tpu.memory_space<vmem>>) attributes {dimension_semantics = [], scalar_prefetch = 0 : i64, scratch_operands = 0 : i64, tpu.core_type = #tpu.core_type<tc>} {
    %c0 = arith.constant 0 : index
    %0 = memref.load %arg0[%c0] : memref<32xi32, #tpu.memory_space<smem>>
    %c0_i32 = arith.constant 0 : i32
    %c63_i32 = arith.constant 63 : i32
    %1 = arith.maxsi %c0_i32, %0 : i32
    %2 = arith.minsi %c63_i32, %1 : i32
    %3 = arith.index_cast %2 : i32 to index
    %c0_0 = arith.constant 0 : index
    %4 = vector.load %arg1[%3, %c0_0] : memref<64x32xf32, #tpu.memory_space<vmem>>, vector<1x32xf32>
    %c0_1 = arith.constant 0 : index
    %c0_2 = arith.constant 0 : index
    %5 = vector.load %arg4[%c0_1, %c0_2] : memref<32x32xf32, #tpu.memory_space<vmem>>, vector<1x32xf32>
    tpu.vector_store %arg4[%c0_1, %c0_2], %4 {strides = array<i32>} : memref<32x32xf32, #tpu.memory_space<vmem>>, vector<1x32xf32>,
    %c1 = arith.constant 1 : index
    %6 = memref.load %arg0[%c1] : memref<32xi32, #tpu.memory_space<smem>>
    %c0_i32_3 = arith.constant 0 : i32
    %c63_i32_4 = arith.constant 63 : i32
    %7 = arith.maxsi %c0_i32_3, %6 : i32
    %8 = arith.minsi %c63_i32_4, %7 : i32
    %9 = arith.index_cast %8 : i32 to index
    %c0_5 = arith.constant 0 : index
    %10 = vector.load %arg1[%9, %c0_5] : memref<64x32xf32, #tpu.memory_space<vmem>>, vector<1x32xf32>
    %c1_6 = arith.constant 1 : index
    %c0_7 = arith.constant 0 : index
    %11 = vector.load %arg4[%c1_6, %c0_7] : memref<32x32xf32, #tpu.memory_space<vmem>>, vector<1x32xf32>
    tpu.vector_store %arg4[%c1_6, %c0_7], %10 {strides = array<i32>} : memref<32x32xf32, #tpu.memory_space<vmem>>, vector<1x32xf32>,
    %c2 = arith.constant 2 : index
    %12 = memref.load %arg0[%c2] : memref<32xi32, #tpu.memory_space<smem>>
    %c0_i32_8 = arith.constant 0 : i32
    %c63_i32_9 = arith.constant 63 : i32
    %13 = arith.maxsi %c0_i32_8, %12 : i32
    %14 = arith.minsi %c63_i32_9, %13 : i32
    %15 = arith.index_cast %14 : i32 to index
    %c0_10 = arith.constant 0 : index
    %16 = vector.load %arg1[%15, %c0_10] : memref<64x32xf32, #tpu.memory_space<vmem>>, vector<1x32xf32>
    %c2_11 = arith.constant 2 : index
    %c0_12 = arith.constant 0 : index
    %17 = vector.load %arg4[%c2_11, %c0_12] : memref<32x32xf32, #tpu.memory_space<vmem>>, vector<1x32xf32>
    tpu.vector_store %arg4[%c2_11, %c0_12], %16 {strides = array<i32>} : memref<32x32xf32, #tpu.memory_space<vmem>>, vector<1x32xf32>,
    %c3 = arith.constant 3 : index
    %18 = memref.load %arg0[%c3] : memref<32xi32, #tpu.memory_space<smem>>
    %c0_i32_13 = arith.constant 0 : i32
    %c63_i32_14 = arith.constant 63 : i32
    %19 = arith.maxsi %c0_i32_13, %18 : i32
    %20 = arith.minsi %c63_i32_14, %19 : i32
    %21 = arith.index_cast %20 : i32 to index
    %c0_15 = arith.constant 0 : index
    %22 = vector.load %arg1[%21, %c0_15] : memref<64x32xf32, #tpu.memory_space<vmem>>, vector<1x32xf32>
    %c3_16 = arith.constant 3 : index
    %c0_17 = arith.constant 0 : index
    %23 = vector.load %arg4[%c3_16, %c0_17] : memref<32x32xf32, #tpu.memory_space<vmem>>, vector<1x32xf32>
    tpu.vector_store %arg4[%c3_16, %c0_17], %22 {strides = array<i32>} : memref<32x32xf32, #tpu.memory_space<vmem>>, vector<1x32xf32>,
    %c4 = arith.constant 4 : index
    %24 = memref.load %arg0[%c4] : memref<32xi32, #tpu.memory_space<smem>>
    %c0_i32_18 = arith.constant 0 : i32
    %c63_i32_19 = arith.constant 63 : i32
    %25 = arith.maxsi %c0_i32_18, %24 : i32
    %26 = arith.minsi %c63_i32_19, %25 : i32
    %27 = arith.index_cast %26 : i32 to index
    %c0_20 = arith.constant 0 : index
    %28 = vector.load %arg1[%27, %c0_20] : memref<64x32xf32, #tpu.memory_space<vmem>>, vector<1x32xf32>
    %c4_21 = arith.constant 4 : index
    %c0_22 = arith.constant 0 : index
    %29 = vector.load %arg4[%c4_21, %c0_22] : memref<32x32xf32, #tpu.memory_space<vmem>>, vector<1x32xf32>
    tpu.vector_store %arg4[%c4_21, %c0_22], %28 {strides = array<i32>} : memref<32x32xf32, #tpu.memory_space<vmem>>, vector<1x32xf32>,
    %c5 = arith.constant 5 : index
    %30 = memref.load %arg0[%c5] : memref<32xi32, #tpu.memory_space<smem>>
    %c0_i32_23 = arith.constant 0 : i32
    %c63_i32_24 = arith.constant 63 : i32
    %31 = arith.maxsi %c0_i32_23, %30 : i32
    %32 = arith.minsi %c63_i32_24, %31 : i32
    %33 = arith.index_cast %32 : i32 to index
    %c0_25 = arith.constant 0 : index
    %34 = vector.load %arg1[%33, %c0_25] : memref<64x32xf32, #tpu.memory_space<vmem>>, vector<1x32xf32>
    %c5_26 = arith.constant 5 : index
    %c0_27 = arith.constant 0 : index
    %35 = vector.load %arg4[%c5_26, %c0_27] : memref<32x32xf32, #tpu.memory_space<vmem>>, vector<1x32xf32>
    tpu.vector_store %arg4[%c5_26, %c0_27], %34 {strides = array<i32>} : memref<32x32xf32, #tpu.memory_space<vmem>>, vector<1x32xf32>,
    %c6 = arith.constant 6 : index
    %36 = memref.load %arg0[%c6] : memref<32xi32, #tpu.memory_space<smem>>
    %c0_i32_28 = arith.constant 0 : i32
    %c63_i32_29 = arith.constant 63 : i32
    %37 = arith.maxsi %c0_i32_28, %36 : i32
    %38 = arith.minsi %c63_i32_29, %37 : i32
    %39 = arith.index_cast %38 : i32 to index
    %c0_30 = arith.constant 0 : index
    %40 = vector.load %arg1[%39, %c0_30] : memref<64x32xf32, #tpu.memory_space<vmem>>, vector<1x32xf32>
    %c6_31 = arith.constant 6 : index
    %c0_32 = arith.constant 0 : index
    %41 = vector.load %arg4[%c6_31, %c0_32] : memref<32x32xf32, #tpu.memory_space<vmem>>, vector<1x32xf32>
    tpu.vector_store %arg4[%c6_31, %c0_32], %40 {strides = array<i32>} : memref<32x32xf32, #tpu.memory_space<vmem>>, vector<1x32xf32>,
    %c7 = arith.constant 7 : index
    %42 = memref.load %arg0[%c7] : memref<32xi32, #tpu.memory_space<smem>>
    %c0_i32_33 = arith.constant 0 : i32
    %c63_i32_34 = arith.constant 63 : i32
    %43 = arith.maxsi %c0_i32_33, %42 : i32
    %44 = arith.minsi %c63_i32_34, %43 : i32
    %45 = arith.index_cast %44 : i32 to index
    %c0_35 = arith.constant 0 : index
    %46 = vector.load %arg1[%45, %c0_35] : memref<64x32xf32, #tpu.memory_space<vmem>>, vector<1x32xf32>
    %c7_36 = arith.constant 7 : index
    %c0_37 = arith.constant 0 : index
    %47 = vector.load %arg4[%c7_36, %c0_37] : memref<32x32xf32, #tpu.memory_space<vmem>>, vector<1x32xf32>
    tpu.vector_store %arg4[%c7_36, %c0_37], %46 {strides = array<i32>} : memref<32x32xf32, #tpu.memory_space<vmem>>, vector<1x32xf32>,
    %c8 = arith.constant 8 : index
    %48 = memref.load %arg0[%c8] : memref<32xi32, #tpu.memory_space<smem>>
    %c0_i32_38 = arith.constant 0 : i32
    %c63_i32_39 = arith.constant 63 : i32
    %49 = arith.maxsi %c0_i32_38, %48 : i32
    %50 = arith.minsi %c63_i32_39, %49 : i32
    %51 = arith.index_cast %50 : i32 to index
    %c0_40 = arith.constant 0 : index
    %52 = vector.load %arg1[%51, %c0_40] : memref<64x32xf32, #tpu.memory_space<vmem>>, vector<1x32xf32>
    %c8_41 = arith.constant 8 : index
    %c0_42 = arith.constant 0 : index
    %53 = vector.load %arg4[%c8_41, %c0_42] : memref<32x32xf32, #tpu.memory_space<vmem>>, vector<1x32xf32>
    tpu.vector_store %arg4[%c8_41, %c0_42], %52 {strides = array<i32>} : memref<32x32xf32, #tpu.memory_space<vmem>>, vector<1x32xf32>,
    %c9 = arith.constant 9 : index
    %54 = memref.load %arg0[%c9] : memref<32xi32, #tpu.memory_space<smem>>
    %c0_i32_43 = arith.constant 0 : i32
    %c63_i32_44 = arith.constant 63 : i32
    %55 = arith.maxsi %c0_i32_43, %54 : i32
    %56 = arith.minsi %c63_i32_44, %55 : i32
    %57 = arith.index_cast %56 : i32 to index
    %c0_45 = arith.constant 0 : index
    %58 = vector.load %arg1[%57, %c0_45] : memref<64x32xf32, #tpu.memory_space<vmem>>, vector<1x32xf32>
    %c9_46 = arith.constant 9 : index
    %c0_47 = arith.constant 0 : index
    %59 = vector.load %arg4[%c9_46, %c0_47] : memref<32x32xf32, #tpu.memory_space<vmem>>, vector<1x32xf32>
    tpu.vector_store %arg4[%c9_46, %c0_47], %58 {strides = array<i32>} : memref<32x32xf32, #tpu.memory_space<vmem>>, vector<1x32xf32>,
    %c10 = arith.constant 10 : index
    %60 = memref.load %arg0[%c10] : memref<32xi32, #tpu.memory_space<smem>>
    %c0_i32_48 = arith.constant 0 : i32
    %c63_i32_49 = arith.constant 63 : i32
    %61 = arith.maxsi %c0_i32_48, %60 : i32
    %62 = arith.minsi %c63_i32_49, %61 : i32
    %63 = arith.index_cast %62 : i32 to index
    %c0_50 = arith.constant 0 : index
    %64 = vector.load %arg1[%63, %c0_50] : memref<64x32xf32, #tpu.memory_space<vmem>>, vector<1x32xf32>
    %c10_51 = arith.constant 10 : index
    %c0_52 = arith.constant 0 : index
    %65 = vector.load %arg4[%c10_51, %c0_52] : memref<32x32xf32, #tpu.memory_space<vmem>>, vector<1x32xf32>
    tpu.vector_store %arg4[%c10_51, %c0_52], %64 {strides = array<i32>} : memref<32x32xf32, #tpu.memory_space<vmem>>, vector<1x32xf32>,
    %c11 = arith.constant 11 : index
    %66 = memref.load %arg0[%c11] : memref<32xi32, #tpu.memory_space<smem>>
    %c0_i32_53 = arith.constant 0 : i32
    %c63_i32_54 = arith.constant 63 : i32
    %67 = arith.maxsi %c0_i32_53, %66 : i32
    %68 = arith.minsi %c63_i32_54, %67 : i32
    %69 = arith.index_cast %68 : i32 to index
    %c0_55 = arith.constant 0 : index
    %70 = vector.load %arg1[%69, %c0_55] : memref<64x32xf32, #tpu.memory_space<vmem>>, vector<1x32xf32>
    %c11_56 = arith.constant 11 : index
    %c0_57 = arith.constant 0 : index
    %71 = vector.load %arg4[%c11_56, %c0_57] : memref<32x32xf32, #tpu.memory_space<vmem>>, vector<1x32xf32>
    tpu.vector_store %arg4[%c11_56, %c0_57], %70 {strides = array<i32>} : memref<32x32xf32, #tpu.memory_space<vmem>>, vector<1x32xf32>,
    %c12 = arith.constant 12 : index
    %72 = memref.load %arg0[%c12] : memref<32xi32, #tpu.memory_space<smem>>
    %c0_i32_58 = arith.constant 0 : i32
    %c63_i32_59 = arith.constant 63 : i32
    %73 = arith.maxsi %c0_i32_58, %72 : i32
    %74 = arith.minsi %c63_i32_59, %73 : i32
    %75 = arith.index_cast %74 : i32 to index
    %c0_60 = arith.constant 0 : index
    %76 = vector.load %arg1[%75, %c0_60] : memref<64x32xf32, #tpu.memory_space<vmem>>, vector<1x32xf32>
    %c12_61 = arith.constant 12 : index
    %c0_62 = arith.constant 0 : index
    %77 = vector.load %arg4[%c12_61, %c0_62] : memref<32x32xf32, #tpu.memory_space<vmem>>, vector<1x32xf32>
    tpu.vector_store %arg4[%c12_61, %c0_62], %76 {strides = array<i32>} : memref<32x32xf32, #tpu.memory_space<vmem>>, vector<1x32xf32>,
    %c13 = arith.constant 13 : index
    %78 = memref.load %arg0[%c13] : memref<32xi32, #tpu.memory_space<smem>>
    %c0_i32_63 = arith.constant 0 : i32
    %c63_i32_64 = arith.constant 63 : i32
    %79 = arith.maxsi %c0_i32_63, %78 : i32
    %80 = arith.minsi %c63_i32_64, %79 : i32
    %81 = arith.index_cast %80 : i32 to index
    %c0_65 = arith.constant 0 : index
    %82 = vector.load %arg1[%81, %c0_65] : memref<64x32xf32, #tpu.memory_space<vmem>>, vector<1x32xf32>
    %c13_66 = arith.constant 13 : index
    %c0_67 = arith.constant 0 : index
    %83 = vector.load %arg4[%c13_66, %c0_67] : memref<32x32xf32, #tpu.memory_space<vmem>>, vector<1x32xf32>
    tpu.vector_store %arg4[%c13_66, %c0_67], %82 {strides = array<i32>} : memref<32x32xf32, #tpu.memory_space<vmem>>, vector<1x32xf32>,
    %c14 = arith.constant 14 : index
    %84 = memref.load %arg0[%c14] : memref<32xi32, #tpu.memory_space<smem>>
    %c0_i32_68 = arith.constant 0 : i32
    %c63_i32_69 = arith.constant 63 : i32
    %85 = arith.maxsi %c0_i32_68, %84 : i32
    %86 = arith.minsi %c63_i32_69, %85 : i32
    %87 = arith.index_cast %86 : i32 to index
    %c0_70 = arith.constant 0 : index
    %88 = vector.load %arg1[%87, %c0_70] : memref<64x32xf32, #tpu.memory_space<vmem>>, vector<1x32xf32>
    %c14_71 = arith.constant 14 : index
    %c0_72 = arith.constant 0 : index
    %89 = vector.load %arg4[%c14_71, %c0_72] : memref<32x32xf32, #tpu.memory_space<vmem>>, vector<1x32xf32>
    tpu.vector_store %arg4[%c14_71, %c0_72], %88 {strides = array<i32>} : memref<32x32xf32, #tpu.memory_space<vmem>>, vector<1x32xf32>,
    %c15 = arith.constant 15 : index
    %90 = memref.load %arg0[%c15] : memref<32xi32, #tpu.memory_space<smem>>
    %c0_i32_73 = arith.constant 0 : i32
    %c63_i32_74 = arith.constant 63 : i32
    %91 = arith.maxsi %c0_i32_73, %90 : i32
    %92 = arith.minsi %c63_i32_74, %91 : i32
    %93 = arith.index_cast %92 : i32 to index
    %c0_75 = arith.constant 0 : index
    %94 = vector.load %arg1[%93, %c0_75] : memref<64x32xf32, #tpu.memory_space<vmem>>, vector<1x32xf32>
    %c15_76 = arith.constant 15 : index
    %c0_77 = arith.constant 0 : index
    %95 = vector.load %arg4[%c15_76, %c0_77] : memref<32x32xf32, #tpu.memory_space<vmem>>, vector<1x32xf32>
    tpu.vector_store %arg4[%c15_76, %c0_77], %94 {strides = array<i32>} : memref<32x32xf32, #tpu.memory_space<vmem>>, vector<1x32xf32>,
    %c16 = arith.constant 16 : index
    %96 = memref.load %arg0[%c16] : memref<32xi32, #tpu.memory_space<smem>>
    %c0_i32_78 = arith.constant 0 : i32
    %c63_i32_79 = arith.constant 63 : i32
    %97 = arith.maxsi %c0_i32_78, %96 : i32
    %98 = arith.minsi %c63_i32_79, %97 : i32
    %99 = arith.index_cast %98 : i32 to index
    %c0_80 = arith.constant 0 : index
    %100 = vector.load %arg1[%99, %c0_80] : memref<64x32xf32, #tpu.memory_space<vmem>>, vector<1x32xf32>
    %c16_81 = arith.constant 16 : index
    %c0_82 = arith.constant 0 : index
    %101 = vector.load %arg4[%c16_81, %c0_82] : memref<32x32xf32, #tpu.memory_space<vmem>>, vector<1x32xf32>
    tpu.vector_store %arg4[%c16_81, %c0_82], %100 {strides = array<i32>} : memref<32x32xf32, #tpu.memory_space<vmem>>, vector<1x32xf32>,
    %c17 = arith.constant 17 : index
    %102 = memref.load %arg0[%c17] : memref<32xi32, #tpu.memory_space<smem>>
    %c0_i32_83 = arith.constant 0 : i32
    %c63_i32_84 = arith.constant 63 : i32
    %103 = arith.maxsi %c0_i32_83, %102 : i32
    %104 = arith.minsi %c63_i32_84, %103 : i32
    %105 = arith.index_cast %104 : i32 to index
    %c0_85 = arith.constant 0 : index
    %106 = vector.load %arg1[%105, %c0_85] : memref<64x32xf32, #tpu.memory_space<vmem>>, vector<1x32xf32>
    %c17_86 = arith.constant 17 : index
    %c0_87 = arith.constant 0 : index
    %107 = vector.load %arg4[%c17_86, %c0_87] : memref<32x32xf32, #tpu.memory_space<vmem>>, vector<1x32xf32>
    tpu.vector_store %arg4[%c17_86, %c0_87], %106 {strides = array<i32>} : memref<32x32xf32, #tpu.memory_space<vmem>>, vector<1x32xf32>,
    %c18 = arith.constant 18 : index
    %108 = memref.load %arg0[%c18] : memref<32xi32, #tpu.memory_space<smem>>
    %c0_i32_88 = arith.constant 0 : i32
    %c63_i32_89 = arith.constant 63 : i32
    %109 = arith.maxsi %c0_i32_88, %108 : i32
    %110 = arith.minsi %c63_i32_89, %109 : i32
    %111 = arith.index_cast %110 : i32 to index
    %c0_90 = arith.constant 0 : index
    %112 = vector.load %arg1[%111, %c0_90] : memref<64x32xf32, #tpu.memory_space<vmem>>, vector<1x32xf32>
    %c18_91 = arith.constant 18 : index
    %c0_92 = arith.constant 0 : index
    %113 = vector.load %arg4[%c18_91, %c0_92] : memref<32x32xf32, #tpu.memory_space<vmem>>, vector<1x32xf32>
    tpu.vector_store %arg4[%c18_91, %c0_92], %112 {strides = array<i32>} : memref<32x32xf32, #tpu.memory_space<vmem>>, vector<1x32xf32>,
    %c19 = arith.constant 19 : index
    %114 = memref.load %arg0[%c19] : memref<32xi32, #tpu.memory_space<smem>>
    %c0_i32_93 = arith.constant 0 : i32
    %c63_i32_94 = arith.constant 63 : i32
    %115 = arith.maxsi %c0_i32_93, %114 : i32
    %116 = arith.minsi %c63_i32_94, %115 : i32
    %117 = arith.index_cast %116 : i32 to index
    %c0_95 = arith.constant 0 : index
    %118 = vector.load %arg1[%117, %c0_95] : memref<64x32xf32, #tpu.memory_space<vmem>>, vector<1x32xf32>
    %c19_96 = arith.constant 19 : index
    %c0_97 = arith.constant 0 : index
    %119 = vector.load %arg4[%c19_96, %c0_97] : memref<32x32xf32, #tpu.memory_space<vmem>>, vector<1x32xf32>
    tpu.vector_store %arg4[%c19_96, %c0_97], %118 {strides = array<i32>} : memref<32x32xf32, #tpu.memory_space<vmem>>, vector<1x32xf32>,
    %c20 = arith.constant 20 : index
    %120 = memref.load %arg0[%c20] : memref<32xi32, #tpu.memory_space<smem>>
    %c0_i32_98 = arith.constant 0 : i32
    %c63_i32_99 = arith.constant 63 : i32
    %121 = arith.maxsi %c0_i32_98, %120 : i32
    %122 = arith.minsi %c63_i32_99, %121 : i32
    %123 = arith.index_cast %122 : i32 to index
    %c0_100 = arith.constant 0 : index
    %124 = vector.load %arg1[%123, %c0_100] : memref<64x32xf32, #tpu.memory_space<vmem>>, vector<1x32xf32>
    %c20_101 = arith.constant 20 : index
    %c0_102 = arith.constant 0 : index
    %125 = vector.load %arg4[%c20_101, %c0_102] : memref<32x32xf32, #tpu.memory_space<vmem>>, vector<1x32xf32>
    tpu.vector_store %arg4[%c20_101, %c0_102], %124 {strides = array<i32>} : memref<32x32xf32, #tpu.memory_space<vmem>>, vector<1x32xf32>,
    %c21 = arith.constant 21 : index
    %126 = memref.load %arg0[%c21] : memref<32xi32, #tpu.memory_space<smem>>
    %c0_i32_103 = arith.constant 0 : i32
    %c63_i32_104 = arith.constant 63 : i32
    %127 = arith.maxsi %c0_i32_103, %126 : i32
    %128 = arith.minsi %c63_i32_104, %127 : i32
    %129 = arith.index_cast %128 : i32 to index
    %c0_105 = arith.constant 0 : index
    %130 = vector.load %arg1[%129, %c0_105] : memref<64x32xf32, #tpu.memory_space<vmem>>, vector<1x32xf32>
    %c21_106 = arith.constant 21 : index
    %c0_107 = arith.constant 0 : index
    %131 = vector.load %arg4[%c21_106, %c0_107] : memref<32x32xf32, #tpu.memory_space<vmem>>, vector<1x32xf32>
    tpu.vector_store %arg4[%c21_106, %c0_107], %130 {strides = array<i32>} : memref<32x32xf32, #tpu.memory_space<vmem>>, vector<1x32xf32>,
    %c22 = arith.constant 22 : index
    %132 = memref.load %arg0[%c22] : memref<32xi32, #tpu.memory_space<smem>>
    %c0_i32_108 = arith.constant 0 : i32
    %c63_i32_109 = arith.constant 63 : i32
    %133 = arith.maxsi %c0_i32_108, %132 : i32
    %134 = arith.minsi %c63_i32_109, %133 : i32
    %135 = arith.index_cast %134 : i32 to index
    %c0_110 = arith.constant 0 : index
    %136 = vector.load %arg1[%135, %c0_110] : memref<64x32xf32, #tpu.memory_space<vmem>>, vector<1x32xf32>
    %c22_111 = arith.constant 22 : index
    %c0_112 = arith.constant 0 : index
    %137 = vector.load %arg4[%c22_111, %c0_112] : memref<32x32xf32, #tpu.memory_space<vmem>>, vector<1x32xf32>
    tpu.vector_store %arg4[%c22_111, %c0_112], %136 {strides = array<i32>} : memref<32x32xf32, #tpu.memory_space<vmem>>, vector<1x32xf32>,
    %c23 = arith.constant 23 : index
    %138 = memref.load %arg0[%c23] : memref<32xi32, #tpu.memory_space<smem>>
    %c0_i32_113 = arith.constant 0 : i32
    %c63_i32_114 = arith.constant 63 : i32
    %139 = arith.maxsi %c0_i32_113, %138 : i32
    %140 = arith.minsi %c63_i32_114, %139 : i32
    %141 = arith.index_cast %140 : i32 to index
    %c0_115 = arith.constant 0 : index
    %142 = vector.load %arg1[%141, %c0_115] : memref<64x32xf32, #tpu.memory_space<vmem>>, vector<1x32xf32>
    %c23_116 = arith.constant 23 : index
    %c0_117 = arith.constant 0 : index
    %143 = vector.load %arg4[%c23_116, %c0_117] : memref<32x32xf32, #tpu.memory_space<vmem>>, vector<1x32xf32>
    tpu.vector_store %arg4[%c23_116, %c0_117], %142 {strides = array<i32>} : memref<32x32xf32, #tpu.memory_space<vmem>>, vector<1x32xf32>,
    %c24 = arith.constant 24 : index
    %144 = memref.load %arg0[%c24] : memref<32xi32, #tpu.memory_space<smem>>
    %c0_i32_118 = arith.constant 0 : i32
    %c63_i32_119 = arith.constant 63 : i32
    %145 = arith.maxsi %c0_i32_118, %144 : i32
    %146 = arith.minsi %c63_i32_119, %145 : i32
    %147 = arith.index_cast %146 : i32 to index
    %c0_120 = arith.constant 0 : index
    %148 = vector.load %arg1[%147, %c0_120] : memref<64x32xf32, #tpu.memory_space<vmem>>, vector<1x32xf32>
    %c24_121 = arith.constant 24 : index
    %c0_122 = arith.constant 0 : index
    %149 = vector.load %arg4[%c24_121, %c0_122] : memref<32x32xf32, #tpu.memory_space<vmem>>, vector<1x32xf32>
    tpu.vector_store %arg4[%c24_121, %c0_122], %148 {strides = array<i32>} : memref<32x32xf32, #tpu.memory_space<vmem>>, vector<1x32xf32>,
    %c25 = arith.constant 25 : index
    %150 = memref.load %arg0[%c25] : memref<32xi32, #tpu.memory_space<smem>>
    %c0_i32_123 = arith.constant 0 : i32
    %c63_i32_124 = arith.constant 63 : i32
    %151 = arith.maxsi %c0_i32_123, %150 : i32
    %152 = arith.minsi %c63_i32_124, %151 : i32
    %153 = arith.index_cast %152 : i32 to index
    %c0_125 = arith.constant 0 : index
    %154 = vector.load %arg1[%153, %c0_125] : memref<64x32xf32, #tpu.memory_space<vmem>>, vector<1x32xf32>
    %c25_126 = arith.constant 25 : index
    %c0_127 = arith.constant 0 : index
    %155 = vector.load %arg4[%c25_126, %c0_127] : memref<32x32xf32, #tpu.memory_space<vmem>>, vector<1x32xf32>
    tpu.vector_store %arg4[%c25_126, %c0_127], %154 {strides = array<i32>} : memref<32x32xf32, #tpu.memory_space<vmem>>, vector<1x32xf32>,
    %c26 = arith.constant 26 : index
    %156 = memref.load %arg0[%c26] : memref<32xi32, #tpu.memory_space<smem>>
    %c0_i32_128 = arith.constant 0 : i32
    %c63_i32_129 = arith.constant 63 : i32
    %157 = arith.maxsi %c0_i32_128, %156 : i32
    %158 = arith.minsi %c63_i32_129, %157 : i32
    %159 = arith.index_cast %158 : i32 to index
    %c0_130 = arith.constant 0 : index
    %160 = vector.load %arg1[%159, %c0_130] : memref<64x32xf32, #tpu.memory_space<vmem>>, vector<1x32xf32>
    %c26_131 = arith.constant 26 : index
    %c0_132 = arith.constant 0 : index
    %161 = vector.load %arg4[%c26_131, %c0_132] : memref<32x32xf32, #tpu.memory_space<vmem>>, vector<1x32xf32>
    tpu.vector_store %arg4[%c26_131, %c0_132], %160 {strides = array<i32>} : memref<32x32xf32, #tpu.memory_space<vmem>>, vector<1x32xf32>,
    %c27 = arith.constant 27 : index
    %162 = memref.load %arg0[%c27] : memref<32xi32, #tpu.memory_space<smem>>
    %c0_i32_133 = arith.constant 0 : i32
    %c63_i32_134 = arith.constant 63 : i32
    %163 = arith.maxsi %c0_i32_133, %162 : i32
    %164 = arith.minsi %c63_i32_134, %163 : i32
    %165 = arith.index_cast %164 : i32 to index
    %c0_135 = arith.constant 0 : index
    %166 = vector.load %arg1[%165, %c0_135] : memref<64x32xf32, #tpu.memory_space<vmem>>, vector<1x32xf32>
    %c27_136 = arith.constant 27 : index
    %c0_137 = arith.constant 0 : index
    %167 = vector.load %arg4[%c27_136, %c0_137] : memref<32x32xf32, #tpu.memory_space<vmem>>, vector<1x32xf32>
    tpu.vector_store %arg4[%c27_136, %c0_137], %166 {strides = array<i32>} : memref<32x32xf32, #tpu.memory_space<vmem>>, vector<1x32xf32>,
    %c28 = arith.constant 28 : index
    %168 = memref.load %arg0[%c28] : memref<32xi32, #tpu.memory_space<smem>>
    %c0_i32_138 = arith.constant 0 : i32
    %c63_i32_139 = arith.constant 63 : i32
    %169 = arith.maxsi %c0_i32_138, %168 : i32
    %170 = arith.minsi %c63_i32_139, %169 : i32
    %171 = arith.index_cast %170 : i32 to index
    %c0_140 = arith.constant 0 : index
    %172 = vector.load %arg1[%171, %c0_140] : memref<64x32xf32, #tpu.memory_space<vmem>>, vector<1x32xf32>
    %c28_141 = arith.constant 28 : index
    %c0_142 = arith.constant 0 : index
    %173 = vector.load %arg4[%c28_141, %c0_142] : memref<32x32xf32, #tpu.memory_space<vmem>>, vector<1x32xf32>
    tpu.vector_store %arg4[%c28_141, %c0_142], %172 {strides = array<i32>} : memref<32x32xf32, #tpu.memory_space<vmem>>, vector<1x32xf32>,
    %c29 = arith.constant 29 : index
    %174 = memref.load %arg0[%c29] : memref<32xi32, #tpu.memory_space<smem>>
    %c0_i32_143 = arith.constant 0 : i32
    %c63_i32_144 = arith.constant 63 : i32
    %175 = arith.maxsi %c0_i32_143, %174 : i32
    %176 = arith.minsi %c63_i32_144, %175 : i32
    %177 = arith.index_cast %176 : i32 to index
    %c0_145 = arith.constant 0 : index
    %178 = vector.load %arg1[%177, %c0_145] : memref<64x32xf32, #tpu.memory_space<vmem>>, vector<1x32xf32>
    %c29_146 = arith.constant 29 : index
    %c0_147 = arith.constant 0 : index
    %179 = vector.load %arg4[%c29_146, %c0_147] : memref<32x32xf32, #tpu.memory_space<vmem>>, vector<1x32xf32>
    tpu.vector_store %arg4[%c29_146, %c0_147], %178 {strides = array<i32>} : memref<32x32xf32, #tpu.memory_space<vmem>>, vector<1x32xf32>,
    %c30 = arith.constant 30 : index
    %180 = memref.load %arg0[%c30] : memref<32xi32, #tpu.memory_space<smem>>
    %c0_i32_148 = arith.constant 0 : i32
    %c63_i32_149 = arith.constant 63 : i32
    %181 = arith.maxsi %c0_i32_148, %180 : i32
    %182 = arith.minsi %c63_i32_149, %181 : i32
    %183 = arith.index_cast %182 : i32 to index
    %c0_150 = arith.constant 0 : index
    %184 = vector.load %arg1[%183, %c0_150] : memref<64x32xf32, #tpu.memory_space<vmem>>, vector<1x32xf32>
    %c30_151 = arith.constant 30 : index
    %c0_152 = arith.constant 0 : index
    %185 = vector.load %arg4[%c30_151, %c0_152] : memref<32x32xf32, #tpu.memory_space<vmem>>, vector<1x32xf32>
    tpu.vector_store %arg4[%c30_151, %c0_152], %184 {strides = array<i32>} : memref<32x32xf32, #tpu.memory_space<vmem>>, vector<1x32xf32>,
    %c31 = arith.constant 31 : index
    %186 = memref.load %arg0[%c31] : memref<32xi32, #tpu.memory_space<smem>>
    %c0_i32_153 = arith.constant 0 : i32
    %c63_i32_154 = arith.constant 63 : i32
    %187 = arith.maxsi %c0_i32_153, %186 : i32
    %188 = arith.minsi %c63_i32_154, %187 : i32
    %189 = arith.index_cast %188 : i32 to index
    %c0_155 = arith.constant 0 : index
    %190 = vector.load %arg1[%189, %c0_155] : memref<64x32xf32, #tpu.memory_space<vmem>>, vector<1x32xf32>
    %c31_156 = arith.constant 31 : index
    %c0_157 = arith.constant 0 : index
    %191 = vector.load %arg4[%c31_156, %c0_157] : memref<32x32xf32, #tpu.memory_space<vmem>>, vector<1x32xf32>
    tpu.vector_store %arg4[%c31_156, %c0_157], %190 {strides = array<i32>} : memref<32x32xf32, #tpu.memory_space<vmem>>, vector<1x32xf32>,
    %c0_158 = arith.constant 0 : index
    %c0_159 = arith.constant 0 : index
    %192 = vector.load %arg4[%c0_158, %c0_159] : memref<32x32xf32, #tpu.memory_space<vmem>>, vector<32x32xf32>
    %c0_160 = arith.constant 0 : index
    %c0_161 = arith.constant 0 : index
    %193 = vector.load %arg2[%c0_160, %c0_161] : memref<32x32xf32, #tpu.memory_space<vmem>>, vector<32x32xf32>
    %194 = arith.addf %192, %193 : vector<32x32xf32>
    %c0_162 = arith.constant 0 : index
    %c0_163 = arith.constant 0 : index
    %195 = vector.load %arg3[%c0_162, %c0_163] : memref<32x32xi32, #tpu.memory_space<vmem>>, vector<32x32xi32>
    %c429496729_i32 = arith.constant 429496729 : i32
    %196 = vector.broadcast %c429496729_i32 : i32 to vector<32x32xi32>
    %197 = arith.cmpi uge, %195, %196 : vector<32x32xi32>
    %cst = arith.constant 1.11111116 : f32
    %198 = vector.broadcast %cst : f32 to vector<32x32xf32>
    %199 = arith.mulf %194, %198 : vector<32x32xf32>
    %cst_164 = arith.constant 0.000000e+00 : f32
    %200 = vector.broadcast %cst_164 : f32 to vector<32x32xf32>
    %201 = arith.select %197, %199, %200 : vector<32x32xi1>, vector<32x32xf32>
    %c0_165 = arith.constant 0 : index
    %c0_166 = arith.constant 0 : index
    %202 = vector.load %arg4[%c0_165, %c0_166] : memref<32x32xf32, #tpu.memory_space<vmem>>, vector<32x32xf32>
    tpu.vector_store %arg4[%c0_165, %c0_166], %201 {strides = array<i32>} : memref<32x32xf32, #tpu.memory_space<vmem>>, vector<32x32xf32>,
    return
  }
}

</mosaic_0001>

<bundles_post_ra>
// kernel: tpu_custom_call.1
= control target key start
LH: loop header
LB: loop body
LE: loop exit
PB: predicated region body
PF: predicated region fallthrough
CT: control target
= control target key end

     0   :  { %9 = vsyncpa [#allocation4], 0  ;;  %s997_s0 = inlined_call_operand.vmem [shape: s32[32], index: 0, kind: input, shape index: {}]   ;;  %s998_s1 = inlined_call_operand.vmem [shape: f32[64,32], index: 1, kind: input, shape index: {}]   ;;  %s999_s2 = inlined_call_operand.vmem [shape: f32[32,32], index: 2, kind: input, shape index: {}]   ;;  %s1000_s3 = inlined_call_operand.vmem [shape: u32[32,32], index: 3, kind: input, shape index: {}]   ;;  %s1001_s4 = inlined_call_operand.hbm [shape: f32[32,32], index: 4, kind: output, shape index: {}]  }
   0x1   :  { %10 = vsyncpa [#allocation3], 0  ;;  %s17_s17 = sshll.u32 %s997_s0, 4  ;;  %s18_s17 = int_to_ptr.vmem [resolvable:$true] %s17_s17 }
   0x2   :  { %s629_s18 = scalar_lea.vmem %s18_s17, 16  ;;  %p634_p1 = scmp.lt.s32.totalorder %s18_s17, %s18_s17 }
   0x3   :  { %p630_p0 = scmp.ne.s32.totalorder %s18_s17, %s629_s18  ;;  %p635_p2 = scmp.lt.s32.totalorder %s629_s18, %s629_s18 }
   0x5   :  { %p636_p3 = por %p635_p2, %p634_p1 }
   0x7   :  { %p637_p4 = pnand %p636_p3, %p630_p0 }
   0x9   :  { %640 = shalt.err (!%p637_p4)
}
   0xa   :  { %s667_s19 = smov [#allocation2]  }
   0xb   :  { %20 = dma.vmem_to_smem %s18_s17, 16, %s667_s19, [#allocation4]  }
   0xc   :  { %663 = dma.done.wait [#allocation4], 16  }
   0xd   :  { %664 = vsyncadd [#allocation4], 4294967280 }
   0xe   :  { %30 = sfence }
   0xf   :  { %s31_s20 = sld [smem:[#allocation2]]  ;;  %s375_s21 = sld [smem:[#allocation2 + $0x1]]  ;;  %vm38_vm0 = vcmask 253952   ;;  %v292_v9 = vld [vmem:[%s999_s2] sm:$0xff]  ;;  %vm316_vm2 = vcmask 261120   ;;  %v293_v23 = vld [vmem:[%s999_s2 + $0x8] sm:$0xff] }
  0x10   :  { %s699_s22 = sld [smem:[#allocation2 + $0x2]]  ;;  %s701_s23 = sld [smem:[#allocation2 + $0x3]]  ;;  %v300_v11 = vld [vmem:[%s1000_s3] sm:$0xff]  ;;  %v301_v25 = vld [vmem:[%s1000_s3 + $0x8] sm:$0xff]  ;;  %v294_v37 = vld [vmem:[%s999_s2 + $0x10] sm:$0xff] }
  0x11   :  { %s703_s0 = sld [smem:[#allocation2 + $0x4]]  ;;  %s705_s24 = sld [smem:[#allocation2 + $0x5]]  ;;  %vm304_vm1 = vcmp.ge.u32.totalorder %v300_v11, 429496729  ;;  %vm305_vm3 = vcmp.ge.u32.totalorder %v301_v25, 429496729 }
  0x12   :  { %s707_s25 = sld [smem:[#allocation2 + $0x6]]  ;;  %s709_s26 = sld [smem:[#allocation2 + $0x7]]  ;;  %v302_v39 = vld [vmem:[%s1000_s3 + $0x10] sm:$0xff]  ;;  %v295_v50 = vld [vmem:[%s999_s2 + $0x18] sm:$0xff] }
  0x13   :  { %s711_s27 = sld [smem:[#allocation2 + $0x8]]  ;;  %s713_s28 = sld [smem:[#allocation2 + $0x9]]  ;;  %vm306_vm4 = vcmp.ge.u32.totalorder %v302_v39, 429496729  ;;  %v303_v51 = vld [vmem:[%s1000_s3 + $0x18] sm:$0xff] }
  0x14   :  { %s715_s29 = sld [smem:[#allocation2 + $0xa]]  ;;  %s717_s30 = sld [smem:[#allocation2 + $0xb]]  ;;  %vm307_vm5 = vcmp.ge.u32.totalorder %v303_v51, 429496729 }
  0x15   :  { %p32_p5 = scmp.gt.s32.totalorder %s31_s20, 0  ;;  %p370_p6 = scmp.lt.s32.totalorder %s31_s20, 63 }
  0x16   :  { %p41_p7 = scmp.gt.s32.totalorder %s375_s21, 0  ;;  %p376_p8 = scmp.lt.s32.totalorder %s375_s21, 63 }
  0x17   :  { %s1003_s20 = smov (!%p32_p5, %s31_s20), 0  ;;  %p49_p9 = scmp.gt.s32.totalorder %s699_s22, 0 }
  0x18   :  { %s1005_s21 = smov (!%p41_p7, %s375_s21), 0  ;;  %s1007_s20 = smov (!%p370_p6, %s1003_s20), 63 }
  0x19   :  { %s1009_s21 = smov (!%p376_p8, %s1005_s21), 63  ;;  %s36_s7 = scalar_lea.vmem %s998_s1, %s1007_s20 }
  0x1a   :  { %v37_v0 = vld [vmem:[%s36_s7] sm:$0x1]  ;;  %s45_s10 = scalar_lea.vmem %s998_s1, %s1009_s21  ;;  %p382_p10 = scmp.lt.s32.totalorder %s699_s22, 63 }
  0x1b   :  { %39 = vst.msk [vmem:[#allocation5] sm:$0x1] %vm38_vm0, %v37_v0  ;;  %v46_v1 = vld [vmem:[%s45_s10] sm:$0x1]  ;;  %s1011_s22 = smov (!%p49_p9, %s699_s22), 0  ;;  %p57_p11 = scmp.gt.s32.totalorder %s701_s23, 0 }
  0x1c   :  { %47 = vst.msk [vmem:[#allocation5 + $0x1] sm:$0x1] %vm38_vm0, %v46_v1  ;;  %p388_p12 = scmp.lt.s32.totalorder %s701_s23, 63  ;;  %s1013_s22 = smov (!%p382_p10, %s1011_s22), 63 }
  0x1d   :  { %s1015_s23 = smov (!%p57_p11, %s701_s23), 0  ;;  %s53_s13 = scalar_lea.vmem %s998_s1, %s1013_s22 }
  0x1e   :  { %p65_p13 = scmp.gt.s32.totalorder %s703_s0, 0  ;;  %v54_v2 = vld [vmem:[%s53_s13] sm:$0x1]  ;;  %s1017_s23 = smov (!%p388_p12, %s1015_s23), 63 }
  0x1f   :  { %55 = vst.msk [vmem:[#allocation5 + $0x2] sm:$0x1] %vm38_vm0, %v54_v2  ;;  %s61_s17 = scalar_lea.vmem %s998_s1, %s1017_s23  ;;  %p394_p0 = scmp.lt.s32.totalorder %s703_s0, 63 }
  0x20   :  { %s66_s14 = scalar_select %p65_p13, %s703_s0, 0  ;;  %v62_v3 = vld [vmem:[%s61_s17] sm:$0x1] }
  0x21   :  { %p73_p1 = scmp.gt.s32.totalorder %s705_s24, 0  ;;  %p400_p2 = scmp.lt.s32.totalorder %s705_s24, 63  ;;  %63 = vst.msk [vmem:[#allocation5 + $0x3] sm:$0x1] %vm38_vm0, %v62_v3 }
  0x22   :  { %s1019_s14 = smov (!%p394_p0, %s66_s14), 63  ;;  %p81_p3 = scmp.gt.s32.totalorder %s707_s25, 0 }
  0x23   :  { %s1021_s24 = smov (!%p73_p1, %s705_s24), 0  ;;  %s69_s20 = scalar_lea.vmem %s998_s1, %s1019_s14 }
  0x24   :  { %v70_v4 = vld [vmem:[%s69_s20] sm:$0x1]  ;;  %s1023_s24 = smov (!%p400_p2, %s1021_s24), 63  ;;  %p406_p4 = scmp.lt.s32.totalorder %s707_s25, 63 }
  0x25   :  { %71 = vst.msk [vmem:[#allocation5 + $0x4] sm:$0x1] %vm38_vm0, %v70_v4  ;;  %s82_s21 = scalar_select %p81_p3, %s707_s25, 0 }
  0x26   :  { %s77_s0 = scalar_lea.vmem %s998_s1, %s1023_s24  ;;  %p89_p5 = scmp.gt.s32.totalorder %s709_s26, 0 }
  0x27   :  { %v78_v5 = vld [vmem:[%s77_s0] sm:$0x1]  ;;  %p412_p6 = scmp.lt.s32.totalorder %s709_s26, 63  ;;  %s1025_s21 = smov (!%p406_p4, %s82_s21), 63 }
  0x28   :  { %79 = vst.msk [vmem:[#allocation5 + $0x5] sm:$0x1] %vm38_vm0, %v78_v5  ;;  %s1027_s26 = smov (!%p89_p5, %s709_s26), 0  ;;  %s85_s7 = scalar_lea.vmem %s998_s1, %s1025_s21 }
  0x29   :  { %p97_p7 = scmp.gt.s32.totalorder %s711_s27, 0  ;;  %v86_v6 = vld [vmem:[%s85_s7] sm:$0x1]  ;;  %s1029_s26 = smov (!%p412_p6, %s1027_s26), 63 }
  0x2a   :  { %87 = vst.msk [vmem:[#allocation5 + $0x6] sm:$0x1] %vm38_vm0, %v86_v6  ;;  %s93_s9 = scalar_lea.vmem %s998_s1, %s1029_s26  ;;  %p418_p8 = scmp.lt.s32.totalorder %s711_s27, 63 }
  0x2b   :  { %s98_s24 = scalar_select %p97_p7, %s711_s27, 0  ;;  %v94_v7 = vld [vmem:[%s93_s9] sm:$0x1] }
  0x2c   :  { %p105_p9 = scmp.gt.s32.totalorder %s713_s28, 0  ;;  %p424_p10 = scmp.lt.s32.totalorder %s713_s28, 63  ;;  %95 = vst.msk [vmem:[#allocation5 + $0x7] sm:$0x1] %vm38_vm0, %v94_v7 }
  0x2d   :  { %s1031_s24 = smov (!%p418_p8, %s98_s24), 63  ;;  %p113_p11 = scmp.gt.s32.totalorder %s715_s29, 0 }
  0x2e   :  { %s1033_s28 = smov (!%p105_p9, %s713_s28), 0  ;;  %s101_s12 = scalar_lea.vmem %s998_s1, %s1031_s24 }
  0x2f   :  { %v102_v8 = vld [vmem:[%s101_s12] sm:$0x1]  ;;  %s1035_s28 = smov (!%p424_p10, %s1033_s28), 63  ;;  %p430_p12 = scmp.lt.s32.totalorder %s715_s29, 63 }
  0x30   :  { %103 = vst.msk [vmem:[#allocation5 + $0x8] sm:$0x1] %vm38_vm0, %v102_v8  ;;  %s114_s26 = scalar_select %p113_p11, %s715_s29, 0 }
  0x31   :  { %s109_s14 = scalar_lea.vmem %s998_s1, %s1035_s28  ;;  %p121_p13 = scmp.gt.s32.totalorder %s717_s30, 0 }
  0x32   :  { %v110_v10 = vld [vmem:[%s109_s14] sm:$0x1]  ;;  %p436_p0 = scmp.lt.s32.totalorder %s717_s30, 63  ;;  %s1037_s26 = smov (!%p430_p12, %s114_s26), 63 }
  0x33   :  { %111 = vst.msk [vmem:[#allocation5 + $0x9] sm:$0x1] %vm38_vm0, %v110_v10  ;;  %v288_v12 = vld [vmem:[#allocation5] sm:$0xff]  ;;  %s1039_s30 = smov (!%p121_p13, %s717_s30), 0  ;;  %s117_s29 = scalar_lea.vmem %s998_s1, %s1037_s26 }
  0x34   :  { %v296_v13 = vadd.f32 %v292_v9, %v288_v12  ;;  %s441_s20 = sld [smem:[#allocation2 + $0xc]]  ;;  %v118_v14 = vld [vmem:[%s117_s29] sm:$0x1]  ;;  %s1041_s30 = smov (!%p436_p0, %s1039_s30), 63 }
  0x35   :  { %119 = vst.msk [vmem:[#allocation5 + $0xa] sm:$0x1] %vm38_vm0, %v118_v14  ;;  %s447_s21 = sld [smem:[#allocation2 + $0xd]]  ;;  %s799_s22 = sld [smem:[#allocation2 + $0xe]] }
  0x36   :  { %v308_v15 = vmul.f32 1.1111112, %v296_v13  ;;  %s125_s5 = scalar_lea.vmem %s998_s1, %s1041_s30  ;;  %s804_s6 = sld [smem:[#allocation2 + $0xf]] }
  0x37   :  { %v126_v17 = vld [vmem:[%s125_s5] sm:$0x1]  ;;  %s806_s7 = sld [smem:[#allocation2 + $0x10]]  ;;  %s808_s24 = sld [smem:[#allocation2 + $0x11]] }
  0x38   :  { %v312_v16 = vsel %vm304_vm1, %v308_v15, 0.0  ;;  %127 = vst.msk [vmem:[#allocation5 + $0xb] sm:$0x1] %vm38_vm0, %v126_v17  ;;  %s812_s25 = sld [smem:[#allocation2 + $0x12]]  ;;  %s814_s8 = sld [smem:[#allocation2 + $0x13]] }
  0x39   :  { %317 = vst.msk [vmem:[#allocation5] sm:$0xff] %vm316_vm2, %v312_v16  ;;  %s816_s30 = sld [smem:[#allocation2 + $0x14]]  ;;  %s818_s9 = sld [smem:[#allocation2 + $0x15]] }
  0x3a   :  { %p129_p1 = scmp.gt.s32.totalorder %s441_s20, 0  ;;  %p442_p2 = scmp.lt.s32.totalorder %s441_s20, 63 }
  0x3b   :  { %p137_p3 = scmp.gt.s32.totalorder %s447_s21, 0  ;;  %p448_p4 = scmp.lt.s32.totalorder %s447_s21, 63 }
  0x3c   :  { %s1043_s20 = smov (!%p129_p1, %s441_s20), 0  ;;  %p145_p5 = scmp.gt.s32.totalorder %s799_s22, 0 }
  0x3d   :  { %s1045_s20 = smov (!%p442_p2, %s1043_s20), 63  ;;  %s1047_s21 = smov (!%p137_p3, %s447_s21), 0 }
  0x3e   :  { %s133_s12 = scalar_lea.vmem %s998_s1, %s1045_s20  ;;  %s1049_s21 = smov (!%p448_p4, %s1047_s21), 63 }
  0x3f   :  { %v134_v18 = vld [vmem:[%s133_s12] sm:$0x1]  ;;  %s146_s26 = scalar_select %p145_p5, %s799_s22, 0 }
  0x40   :  { %135 = vst.msk [vmem:[#allocation5 + $0xc] sm:$0x1] %vm38_vm0, %v134_v18  ;;  %s141_s14 = scalar_lea.vmem %s998_s1, %s1049_s21  ;;  %p454_p6 = scmp.lt.s32.totalorder %s799_s22, 63 }
  0x41   :  { %v142_v19 = vld [vmem:[%s141_s14] sm:$0x1]  ;;  %p153_p7 = scmp.gt.s32.totalorder %s804_s6, 0  ;;  %p460_p8 = scmp.lt.s32.totalorder %s804_s6, 63 }
  0x42   :  { %143 = vst.msk [vmem:[#allocation5 + $0xd] sm:$0x1] %vm38_vm0, %v142_v19  ;;  %s1051_s26 = smov (!%p454_p6, %s146_s26), 63  ;;  %p161_p9 = scmp.gt.s32.totalorder %s806_s7, 0 }
  0x43   :  { %s1053_s6 = smov (!%p153_p7, %s804_s6), 0  ;;  %s149_s17 = scalar_lea.vmem %s998_s1, %s1051_s26 }
  0x44   :  { %v150_v20 = vld [vmem:[%s149_s17] sm:$0x1]  ;;  %s1055_s6 = smov (!%p460_p8, %s1053_s6), 63  ;;  %p466_p10 = scmp.lt.s32.totalorder %s806_s7, 63 }
  0x45   :  { %151 = vst.msk [vmem:[#allocation5 + $0xe] sm:$0x1] %vm38_vm0, %v150_v20  ;;  %s162_s18 = scalar_select %p161_p9, %s806_s7, 0 }
  0x46   :  { %s157_s29 = scalar_lea.vmem %s998_s1, %s1055_s6  ;;  %p169_p11 = scmp.gt.s32.totalorder %s808_s24, 0 }
  0x47   :  { %v158_v21 = vld [vmem:[%s157_s29] sm:$0x1]  ;;  %p472_p12 = scmp.lt.s32.totalorder %s808_s24, 63  ;;  %s1057_s18 = smov (!%p466_p10, %s162_s18), 63 }
  0x48   :  { %159 = vst.msk [vmem:[#allocation5 + $0xf] sm:$0x1] %vm38_vm0, %v158_v21  ;;  %s1059_s24 = smov (!%p169_p11, %s808_s24), 0  ;;  %s165_s22 = scalar_lea.vmem %s998_s1, %s1057_s18 }
  0x49   :  { %p177_p13 = scmp.gt.s32.totalorder %s812_s25, 0  ;;  %v166_v22 = vld [vmem:[%s165_s22] sm:$0x1]  ;;  %s1061_s24 = smov (!%p472_p12, %s1059_s24), 63 }
  0x4a   :  { %167 = vst.msk [vmem:[#allocation5 + $0x10] sm:$0x1] %vm38_vm0, %v166_v22  ;;  %s173_s6 = scalar_lea.vmem %s998_s1, %s1061_s24  ;;  %p478_p0 = scmp.lt.s32.totalorder %s812_s25, 63 }
  0x4b   :  { %s178_s23 = scalar_select %p177_p13, %s812_s25, 0  ;;  %v174_v24 = vld [vmem:[%s173_s6] sm:$0x1] }
  0x4c   :  { %p185_p1 = scmp.gt.s32.totalorder %s814_s8, 0  ;;  %p484_p2 = scmp.lt.s32.totalorder %s814_s8, 63  ;;  %175 = vst.msk [vmem:[#allocation5 + $0x11] sm:$0x1] %vm38_vm0, %v174_v24 }
  0x4d   :  { %s1063_s23 = smov (!%p478_p0, %s178_s23), 63  ;;  %p193_p3 = scmp.gt.s32.totalorder %s816_s30, 0 }
  0x4e   :  { %s1065_s8 = smov (!%p185_p1, %s814_s8), 0  ;;  %s181_s26 = scalar_lea.vmem %s998_s1, %s1063_s23 }
  0x4f   :  { %v289_v26 = vld [vmem:[#allocation5 + $0x8] sm:$0xff]  ;;  %v182_v28 = vld [vmem:[%s181_s26] sm:$0x1]  ;;  %s1067_s8 = smov (!%p484_p2, %s1065_s8), 63  ;;  %p490_p4 = scmp.lt.s32.totalorder %s816_s30, 63 }
  0x50   :  { %v297_v27 = vadd.f32 %v293_v23, %v289_v26  ;;  %183 = vst.msk [vmem:[#allocation5 + $0x12] sm:$0x1] %vm38_vm0, %v182_v28  ;;  %s194_s27 = scalar_select %p193_p3, %s816_s30, 0 }
  0x51   :  { %s189_s15 = scalar_lea.vmem %s998_s1, %s1067_s8  ;;  %p201_p5 = scmp.gt.s32.totalorder %s818_s9, 0 }
  0x52   :  { %v309_v29 = vmul.f32 1.1111112, %v297_v27  ;;  %v190_v31 = vld [vmem:[%s189_s15] sm:$0x1]  ;;  %p496_p6 = scmp.lt.s32.totalorder %s818_s9, 63  ;;  %s1069_s27 = smov (!%p490_p4, %s194_s27), 63 }
  0x53   :  { %191 = vst.msk [vmem:[#allocation5 + $0x13] sm:$0x1] %vm38_vm0, %v190_v31  ;;  %s1071_s9 = smov (!%p201_p5, %s818_s9), 0  ;;  %s197_s18 = scalar_lea.vmem %s998_s1, %s1069_s27 }
  0x54   :  { %v313_v30 = vsel %vm305_vm3, %v309_v29, 0.0  ;;  %s501_s19 = sld [smem:[#allocation2 + $0x16]]  ;;  %v198_v32 = vld [vmem:[%s197_s18] sm:$0x1]  ;;  %s1073_s9 = smov (!%p496_p6, %s1071_s9), 63 }
  0x55   :  { %318 = vst.msk [vmem:[#allocation5 + $0x8] sm:$0xff] %vm316_vm2, %v313_v30  ;;  %s507_s8 = sld [smem:[#allocation2 + $0x17]]  ;;  %s887_s30 = sld [smem:[#allocation2 + $0x18]] }
  0x56   :  { %199 = vst.msk [vmem:[#allocation5 + $0x14] sm:$0x1] %vm38_vm0, %v198_v32  ;;  %s205_s20 = scalar_lea.vmem %s998_s1, %s1073_s9  ;;  %s892_s21 = sld [smem:[#allocation2 + $0x19]] }
  0x57   :  { %v206_v33 = vld [vmem:[%s205_s20] sm:$0x1]  ;;  %s894_s22 = sld [smem:[#allocation2 + $0x1a]]  ;;  %s896_s23 = sld [smem:[#allocation2 + $0x1b]] }
  0x58   :  { %207 = vst.msk [vmem:[#allocation5 + $0x15] sm:$0x1] %vm38_vm0, %v206_v33  ;;  %s899_s0 = sld [smem:[#allocation2 + $0x1c]]  ;;  %s901_s5 = sld [smem:[#allocation2 + $0x1d]] }
  0x59   :  { %s903_s6 = sld [smem:[#allocation2 + $0x1e]]  ;;  %s905_s9 = sld [smem:[#allocation2 + $0x1f]] }
  0x5a   :  { %p209_p7 = scmp.gt.s32.totalorder %s501_s19, 0  ;;  %p502_p8 = scmp.lt.s32.totalorder %s501_s19, 63 }
  0x5b   :  { %p217_p9 = scmp.gt.s32.totalorder %s507_s8, 0  ;;  %p508_p10 = scmp.lt.s32.totalorder %s507_s8, 63 }
  0x5c   :  { %s1075_s19 = smov (!%p209_p7, %s501_s19), 0  ;;  %p225_p11 = scmp.gt.s32.totalorder %s887_s30, 0 }
  0x5d   :  { %s1077_s19 = smov (!%p502_p8, %s1075_s19), 63  ;;  %s1079_s8 = smov (!%p217_p9, %s507_s8), 0 }
  0x5e   :  { %s213_s11 = scalar_lea.vmem %s998_s1, %s1077_s19  ;;  %s1081_s8 = smov (!%p508_p10, %s1079_s8), 63 }
  0x5f   :  { %v214_v34 = vld [vmem:[%s213_s11] sm:$0x1]  ;;  %s226_s12 = scalar_select %p225_p11, %s887_s30, 0 }
  0x60   :  { %215 = vst.msk [vmem:[#allocation5 + $0x16] sm:$0x1] %vm38_vm0, %v214_v34  ;;  %s221_s26 = scalar_lea.vmem %s998_s1, %s1081_s8  ;;  %p514_p12 = scmp.lt.s32.totalorder %s887_s30, 63 }
  0x61   :  { %v222_v35 = vld [vmem:[%s221_s26] sm:$0x1]  ;;  %p233_p13 = scmp.gt.s32.totalorder %s892_s21, 0  ;;  %p520_p0 = scmp.lt.s32.totalorder %s892_s21, 63 }
  0x62   :  { %223 = vst.msk [vmem:[#allocation5 + $0x17] sm:$0x1] %vm38_vm0, %v222_v35  ;;  %s1083_s12 = smov (!%p514_p12, %s226_s12), 63  ;;  %p241_p1 = scmp.gt.s32.totalorder %s894_s22, 0 }
  0x63   :  { %s1085_s21 = smov (!%p233_p13, %s892_s21), 0  ;;  %s229_s14 = scalar_lea.vmem %s998_s1, %s1083_s12 }
  0x64   :  { %v230_v36 = vld [vmem:[%s229_s14] sm:$0x1]  ;;  %s1087_s21 = smov (!%p520_p0, %s1085_s21), 63  ;;  %p526_p2 = scmp.lt.s32.totalorder %s894_s22, 63 }
  0x65   :  { %231 = vst.msk [vmem:[#allocation5 + $0x18] sm:$0x1] %vm38_vm0, %v230_v36  ;;  %s242_s15 = scalar_select %p241_p1, %s894_s22, 0 }
  0x66   :  { %s237_s18 = scalar_lea.vmem %s998_s1, %s1087_s21  ;;  %p249_p3 = scmp.gt.s32.totalorder %s896_s23, 0 }
  0x67   :  { %v238_v38 = vld [vmem:[%s237_s18] sm:$0x1]  ;;  %p532_p4 = scmp.lt.s32.totalorder %s896_s23, 63  ;;  %s1089_s15 = smov (!%p526_p2, %s242_s15), 63 }
  0x68   :  { %239 = vst.msk [vmem:[#allocation5 + $0x19] sm:$0x1] %vm38_vm0, %v238_v38  ;;  %s1091_s23 = smov (!%p249_p3, %s896_s23), 0  ;;  %s245_s21 = scalar_lea.vmem %s998_s1, %s1089_s15 }
  0x69   :  { %v290_v40 = vld [vmem:[#allocation5 + $0x10] sm:$0xff]  ;;  %p257_p5 = scmp.gt.s32.totalorder %s899_s0, 0  ;;  %v246_v42 = vld [vmem:[%s245_s21] sm:$0x1]  ;;  %s1093_s23 = smov (!%p532_p4, %s1091_s23), 63 }
  0x6a   :  { %v298_v41 = vadd.f32 %v294_v37, %v290_v40  ;;  %247 = vst.msk [vmem:[#allocation5 + $0x1a] sm:$0x1] %vm38_vm0, %v246_v42  ;;  %s253_s11 = scalar_lea.vmem %s998_s1, %s1093_s23  ;;  %p538_p6 = scmp.lt.s32.totalorder %s899_s0, 63 }
  0x6b   :  { %s258_s22 = scalar_select %p257_p5, %s899_s0, 0  ;;  %v254_v45 = vld [vmem:[%s253_s11] sm:$0x1] }
  0x6c   :  { %v310_v43 = vmul.f32 1.1111112, %v298_v41  ;;  %p265_p7 = scmp.gt.s32.totalorder %s901_s5, 0  ;;  %p544_p8 = scmp.lt.s32.totalorder %s901_s5, 63  ;;  %255 = vst.msk [vmem:[#allocation5 + $0x1b] sm:$0x1] %vm38_vm0, %v254_v45 }
  0x6d   :  { %s1095_s22 = smov (!%p538_p6, %s258_s22), 63  ;;  %p273_p9 = scmp.gt.s32.totalorder %s903_s6, 0 }
  0x6e   :  { %v314_v44 = vsel %vm306_vm4, %v310_v43, 0.0  ;;  %s1097_s5 = smov (!%p265_p7, %s901_s5), 0  ;;  %s261_s25 = scalar_lea.vmem %s998_s1, %s1095_s22 }
  0x6f   :  { %319 = vst.msk [vmem:[#allocation5 + $0x10] sm:$0xff] %vm316_vm2, %v314_v44  ;;  %v262_v46 = vld [vmem:[%s261_s25] sm:$0x1]  ;;  %s1099_s5 = smov (!%p544_p8, %s1097_s5), 63  ;;  %p550_p10 = scmp.lt.s32.totalorder %s903_s6, 63 }
  0x70   :  { %263 = vst.msk [vmem:[#allocation5 + $0x1c] sm:$0x1] %vm38_vm0, %v262_v46  ;;  %s274_s23 = scalar_select %p273_p9, %s903_s6, 0 }
  0x71   :  { %s269_s27 = scalar_lea.vmem %s998_s1, %s1099_s5  ;;  %p281_p11 = scmp.gt.s32.totalorder %s905_s9, 0 }
  0x72   :  { %v270_v47 = vld [vmem:[%s269_s27] sm:$0x1]  ;;  %p556_p12 = scmp.lt.s32.totalorder %s905_s9, 63  ;;  %s1101_s23 = smov (!%p550_p10, %s274_s23), 63 }
  0x73   :  { %271 = vst.msk [vmem:[#allocation5 + $0x1d] sm:$0x1] %vm38_vm0, %v270_v47  ;;  %s1103_s9 = smov (!%p281_p11, %s905_s9), 0  ;;  %s277_s15 = scalar_lea.vmem %s998_s1, %s1101_s23 }
  0x74   :  { %v278_v48 = vld [vmem:[%s277_s15] sm:$0x1]  ;;  %s1105_s9 = smov (!%p556_p12, %s1103_s9), 63  ;;  %s668_s30 = smov [#allocation5]  }
  0x75   :  { %279 = vst.msk [vmem:[#allocation5 + $0x1e] sm:$0x1] %vm38_vm0, %v278_v48  ;;  %s285_s5 = scalar_lea.vmem %s998_s1, %s1105_s9  ;;  %s326_s28 = sshll.u32 %s668_s30, 4  ;;  %s327_s28 = int_to_ptr.vmem [resolvable:$true] %s326_s28 }
  0x76   :  { %v286_v49 = vld [vmem:[%s285_s5] sm:$0x1]  ;;  %s641_s1 = scalar_lea.vmem %s327_s28, 512  ;;  %p646_p0 = scmp.lt.s32.totalorder %s327_s28, %s327_s28 }
  0x77   :  { %287 = vst.msk [vmem:[#allocation5 + $0x1f] sm:$0x1] %vm38_vm0, %v286_v49  ;;  %p642_p13 = scmp.ne.s32.totalorder %s327_s28, %s641_s1  ;;  %p647_p1 = scmp.lt.s32.totalorder %s641_s1, %s641_s1 }
  0x79   :  { %p648_p2 = por %p647_p1, %p646_p0 }
  0x7b   :  { %p649_p3 = pnand %p648_p2, %p642_p13 }
  0x7e   :  { %v291_v52 = vld [vmem:[#allocation5 + $0x18] sm:$0xff] }
  0x7f   :  { %v299_v53 = vadd.f32 %v295_v50, %v291_v52 }
  0x81   :  { %v311_v54 = vmul.f32 1.1111112, %v299_v53 }
  0x83   :  { %v315_v55 = vsel %vm307_vm5, %v311_v54, 0.0 }
  0x84   :  { %320 = vst.msk [vmem:[#allocation5 + $0x18] sm:$0xff] %vm316_vm2, %v315_v55 }
  0x85   :  { %652 = shalt.err (!%p649_p3)
}
  0x86   :  { %s653_s3 = scalar_lea.hbm %s1001_s4, 512 }
  0x87   :  { %p654_p4 = scmp.ne.s32.totalorder %s1001_s4, %s653_s3  ;;  %p657_p5 = scmp.lt.u32.totalorder %s653_s3, %s1001_s4 }
  0x89   :  { %p659_p6 = pnand %p657_p5, %p654_p4 }
  0x8b   :  { %662 = shalt.err (!%p659_p6)
}
  0x8c   :  { %s669_s7 = smov 128   ;;  %s670_s10 = smov 8  }
  0x8d   :  { %332 = dma.vmem_to_hbm [thread:$0]  %s327_s28, 512, %s1001_s4, [#allocation3], %s669_s7, %s669_s7, %s670_s10  }
  0x8e   :  { %665 = dma.done.wait [#allocation3], 512  }
  0x8f   :  { %666 = vsyncadd [#allocation3], 4294966784 }
  0x90   :  { %336 = vsyncpa [#allocation3], 1 }
  0x91   :  { %337 = vsyncpa [#allocation4], 1 }

</bundles_post_ra>
